<compile_context>
chip_gen: v5e
topology: v5e:2x2
jax: 0.10.0
libtpu: 0.0.40
codegen_flags: <defaults>
</compile_context>

<pallas_src>
import jax
import jax.numpy as jnp
from jax.experimental import pallas as pl
from jax.experimental.pallas import tpu as pltpu


def _cholesky_pt_kernel(x_ref, m_ref, a_ref, o_ref):
    # x_ref: (block_b, nn) flattened factors; m_ref / a_ref: (1, nn) masks.
    #   M[i,j] = W[i,i] on the diagonal, 1 on the strict lower triangle, 0 above
    #   A      = tril(W, -1)
    #   out    = where(M != 0, x * M + A, 0)
    # The where() guarantees the upper triangle is exactly zero even if x
    # carries non-finite values there (torch zeroes unconditionally).
    x = x_ref[...]
    m = m_ref[...]
    a = a_ref[...]
    o_ref[...] = jnp.where(m != 0.0, x * m + a, 0.0).astype(o_ref.dtype)


def _choose_block_b(B, target_block):
    """Pick a sublane-aligned row block.

    Rules (per perf review):
      * no host-side padding: Pallas masks the ragged last block (cdiv grid);
      * keep >= 2 (ideally >= 4) blocks whenever B allows it, so DMA/compute
        overlap and megacore sharding stay effective;
      * cap at target_block so double-buffered in+out stays inside scoped VMEM.
    """
    if B <= 8:
        return B  # single full-dim block; cannot be split below 8 sublanes
    target = max(8, (target_block // 8) * 8)
    min_blocks = 4 if B >= 32 else 2
    n_blocks = max(min_blocks, pl.cdiv(B, target))
    blk = ((pl.cdiv(B, n_blocks) + 7) // 8) * 8  # balanced, rounded up to 8
    return max(8, min(target, blk))


def cholesky_pt_forward(X, W, *, target_block_b=4096):
    """X: (N, h, n, n) float32 Cholesky factors; W: (n, n) float32 parameter."""
    N, h, n, n2 = X.shape
    assert n == n2
    B = N * h
    nn_ = n * n
    dtype = X.dtype

    # Lane-dense layout: flatten trailing (n, n) -> n*n lanes (256 for n=16),
    # a multiple of 128, so output stores are full unmasked vst.
    xb = X.reshape(B, nn_)

    # Precompute the tiny algebraic masks on the host, (1, n*n) each.
    row = jnp.arange(n)[:, None]
    col = jnp.arange(n)[None, :]
    strict_lower = row > col
    diag = row == col
    M = jnp.where(diag, W, jnp.where(strict_lower, 1.0, 0.0)).astype(dtype)
    A = jnp.where(strict_lower, W, 0.0).astype(dtype)  # tril(W, -1)
    M = M.reshape(1, nn_)
    A = A.reshape(1, nn_)

    block_b = _choose_block_b(B, target_block_b)
    grid = (pl.cdiv(B, block_b),)  # ragged last block masked by Pallas

    out = pl.pallas_call(
        _cholesky_pt_kernel,
        out_shape=jax.ShapeDtypeStruct((B, nn_), dtype),
        grid_spec=pltpu.PrefetchScalarGridSpec(
            num_scalar_prefetch=0,
            grid=grid,
            in_specs=[
                pl.BlockSpec((block_b, nn_), lambda i: (i, 0)),
                pl.BlockSpec((1, nn_), lambda i: (0, 0)),
                pl.BlockSpec((1, nn_), lambda i: (0, 0)),
            ],
            out_specs=pl.BlockSpec((block_b, nn_), lambda i: (i, 0)),
        ),
        compiler_params=pltpu.CompilerParams(
            dimension_semantics=("parallel",),
            # 4096-row f32 blocks double-buffered (in + out) are 16 MiB in
            # flight; raise the scoped-VMEM limit so this also fits v5e's
            # 16 MiB default (harmless on v6e/v7x, well under physical VMEM).
            vmem_limit_bytes=40 * 1024 * 1024,
        ),
    )(xb, M, A)

    # torch: permute(2,3,0,1).contiguous().view(n,n,N,h).permute(2,3,0,1) is a
    # value/shape round trip back to (N, h, n, n) -> identity on values/shape.
    return out.reshape(N, h, n, n)


def _make_cholesky_param(n, key):
    """Deterministic stand-in for functional.init_pt_parameter: lower
    triangular with strictly positive diagonal."""
    a = jax.random.normal(key, (n, n), dtype=jnp.float32) * 0.1
    strict = jnp.tril(a, k=-1)
    diag = jnp.diag(jnp.abs(jnp.diag(a)) + 1.0)
    return strict + diag


def _reference(X, W):
    n = W.shape[0]
    row = jnp.arange(n)[:, None]
    col = jnp.arange(n)[None, :]
    strict_lower = row > col
    diag = row == col
    return jnp.where(strict_lower, X + W,
                     jnp.where(diag, X * W, jnp.zeros_like(X)))


if __name__ == "__main__":
    key = jax.random.PRNGKey(0)
    k_x, k_w = jax.random.split(key)

    N, h, n = 2, 4, 16  # X: (N, h, n, n)

    # Build valid Cholesky factors: chol(A A^T + eps I), lower triangular,
    # positive diagonal.
    A = jax.random.normal(k_x, (N, h, n, n), dtype=jnp.float32)
    spd = jnp.einsum("bhik,bhjk->bhij", A, A) + 1e-2 * jnp.eye(n, dtype=jnp.float32)
    X = jnp.linalg.cholesky(spd).astype(jnp.float32)

    W = _make_cholesky_param(n, k_w)

    out = cholesky_pt_forward(X, W)
    out = jax.block_until_ready(out)

    ref = _reference(X, W)
    assert out.shape == (N, h, n, n)
    assert jnp.allclose(out, ref, atol=1e-5, rtol=1e-5), "mismatch vs reference"

    print("KERNEL_OK")
</pallas_src>

<mosaic_0001>
module attributes {stable_mosaic.version = 11 : i64} {
  func.func @_cholesky_pt_kernel(%arg0: i32, %arg1: memref<8x256xf32, #tpu.memory_space<vmem>>, %arg2: memref<1x256xf32, #tpu.memory_space<vmem>>, %arg3: memref<1x256xf32, #tpu.memory_space<vmem>>, %arg4: memref<8x256xf32, #tpu.memory_space<vmem>>) attributes {dimension_semantics = [#tpu.dimension_semantics<parallel>], iteration_bounds = array<i64: 1>, scalar_prefetch = 0 : i64, scratch_operands = 0 : i64, tpu.core_type = #tpu.core_type<tc>, window_params = [{transform_indices = @transform_0, window_bounds = array<i64: 8, 256>}, {pipeline_mode = #tpu.pipeline_mode<synchronous>, transform_indices = @transform_1, window_bounds = array<i64: 1, 256>}, {pipeline_mode = #tpu.pipeline_mode<synchronous>, transform_indices = @transform_2, window_bounds = array<i64: 1, 256>}, {transform_indices = @transform_3, window_bounds = array<i64: 8, 256>}]} {
    %c0 = arith.constant 0 : index
    %c0_0 = arith.constant 0 : index
    %0 = vector.load %arg1[%c0, %c0_0] : memref<8x256xf32, #tpu.memory_space<vmem>>, vector<8x256xf32>
    %c0_1 = arith.constant 0 : index
    %c0_2 = arith.constant 0 : index
    %1 = vector.load %arg2[%c0_1, %c0_2] : memref<1x256xf32, #tpu.memory_space<vmem>>, vector<1x256xf32>
    %c0_3 = arith.constant 0 : index
    %c0_4 = arith.constant 0 : index
    %2 = vector.load %arg3[%c0_3, %c0_4] : memref<1x256xf32, #tpu.memory_space<vmem>>, vector<1x256xf32>
    %cst = arith.constant 0.000000e+00 : f32
    %3 = vector.broadcast %cst : f32 to vector<1x256xf32>
    %4 = arith.cmpf one, %1, %3 : vector<1x256xf32>
    %5 = vector.broadcast %1 : vector<1x256xf32> to vector<8x256xf32>
    %6 = arith.mulf %0, %5 : vector<8x256xf32>
    %7 = vector.broadcast %2 : vector<1x256xf32> to vector<8x256xf32>
    %8 = arith.addf %6, %7 : vector<8x256xf32>
    %cst_5 = arith.constant 0.000000e+00 : f32
    %9 = vector.shape_cast %4 : vector<1x256xi1> to vector<1x256xi1>
    %10 = vector.broadcast %9 : vector<1x256xi1> to vector<8x256xi1>
    %11 = vector.broadcast %cst_5 : f32 to vector<8x256xf32>
    %12 = arith.select %10, %8, %11 : vector<8x256xi1>, vector<8x256xf32>
    %c0_6 = arith.constant 0 : index
    %c0_7 = arith.constant 0 : index
    %13 = vector.load %arg4[%c0_6, %c0_7] : memref<8x256xf32, #tpu.memory_space<vmem>>, vector<8x256xf32>
    tpu.vector_store %arg4[%c0_6, %c0_7], %12 {strides = array<i32>} : memref<8x256xf32, #tpu.memory_space<vmem>>, vector<8x256xf32>,
    return
  }
  func.func @transform_0(%arg0: i32) -> (i32, i32) {
    %c0_i32 = arith.constant 0 : i32
    %c0_i32_0 = arith.constant 0 : i32
    return %arg0, %c0_i32 : i32, i32
  }
  func.func @transform_1(%arg0: i32) -> (i32, i32) {
    %c0_i32 = arith.constant 0 : i32
    %c0_i32_0 = arith.constant 0 : i32
    %c0_i32_1 = arith.constant 0 : i32
    return %c0_i32, %c0_i32_0 : i32, i32
  }
  func.func @transform_2(%arg0: i32) -> (i32, i32) {
    %c0_i32 = arith.constant 0 : i32
    %c0_i32_0 = arith.constant 0 : i32
    %c0_i32_1 = arith.constant 0 : i32
    return %c0_i32, %c0_i32_0 : i32, i32
  }
  func.func @transform_3(%arg0: i32) -> (i32, i32) {
    %c0_i32 = arith.constant 0 : i32
    %c0_i32_0 = arith.constant 0 : i32
    return %arg0, %c0_i32 : i32, i32
  }
}

</mosaic_0001>

<bundles_post_ra>
// kernel: tpu_custom_call.1
= control target key start
LH: loop header
LB: loop body
LE: loop exit
PB: predicated region body
PF: predicated region fallthrough
CT: control target
= control target key end

     0   :  { %8 = vsyncpa [#allocation3], 0  ;;  %s246_s0 = inlined_call_operand.hbm [shape: f32[8,256], index: 0, kind: input, shape index: {}]   ;;  %s247_s1 = inlined_call_operand.hbm [shape: f32[1,256], index: 1, kind: input, shape index: {}]   ;;  %s248_s2 = inlined_call_operand.hbm [shape: f32[1,256], index: 2, kind: input, shape index: {}]   ;;  %s249_s3 = inlined_call_operand.hbm [shape: f32[8,256], index: 3, kind: output, shape index: {}]  }
   0x1   :  { %9 = vsyncpa [#allocation6], 0  ;;  %s27_s14 = sshll.u32 %s247_s1, 4  ;;  %s28_s14 = int_to_ptr.hbm [resolvable:$true] %s27_s14 }
   0x2   :  { %10 = vsyncpa [#allocation4], 0  ;;  %s209_s15 = smov [#allocation5]   ;;  %s16_s19 = sshll.u32 %s246_s0, 4  ;;  %s17_s19 = int_to_ptr.hbm [resolvable:$true] %s16_s19 }
   0x3   :  { %s29_s16 = sshll.u32 %s209_s15, 4  ;;  %s210_s20 = smov [#allocation2]   ;;  %s30_s16 = int_to_ptr.vmem [resolvable:$true] %s29_s16 }
   0x4   :  { %32 = dma.hbm_to_vmem [thread:$0]  %s28_s14, 32, %s30_s16, [#allocation6]  }
   0x5   :  { %s18_s21 = sshll.u32 %s210_s20, 4  ;;  %s38_s24 = sshll.u32 %s248_s2, 4  ;;  %s19_s21 = int_to_ptr.vmem [resolvable:$true] %s18_s21  ;;  %s39_s24 = int_to_ptr.hbm [resolvable:$true] %s38_s24 }
   0x6   :  { %21 = dma.hbm_to_vmem [thread:$0]  %s17_s19, 256, %s19_s21, [#allocation3]  }
   0x7   :  { %s211_s1 = smov [#allocation7]  }
   0x8   :  { %s40_s25 = sshll.u32 %s211_s1, 4  ;;  %s41_s25 = int_to_ptr.vmem [resolvable:$true] %s40_s25 }
   0x9   :  { %43 = dma.hbm_to_vmem [thread:$0]  %s39_s24, 32, %s41_s25, [#allocation6]  }
   0xa   :  { %203 = dma.done.wait [#allocation3], 256  }
   0xb   :  { %204 = vsyncadd [#allocation3], 4294967040 }
   0xc   :  { %205 = dma.done.wait [#allocation6], 64  }
   0xd   :  { %206 = vsyncadd [#allocation6], 4294967232  ;;  %v56_v0 = vld [vmem:[#allocation2] sm:$0xff]  ;;  %v58_v1 = vld [vmem:[#allocation5] sm:$0x3]  ;;  %v212_v7 = vmov 0  }
   0xe   :  { %v59_v2 = vld [vmem:[#allocation7] sm:$0x3]  ;;  %vm60_vm0 = vcmp.ne.f32.partialorder %v58_v1, 0.0  ;;  %v62_v3 = vperm.slane %v58_v1, 0  ;;  %v57_v5 = vld [vmem:[#allocation2 + $0x8] sm:$0xff]  ;;  %v63_v6 = vperm.slane %v58_v1, 1 }
   0xf   :  { %v69_v4 = vperm.slane %v59_v2, 0  ;;  %v75_v8 = vsel %vm60_vm0, 1, %v212_v7  ;;  %v70_v9 = vperm.slane %v59_v2, 1  ;;  %s213_s0 = smov [#allocation8]   ;;  %s91_s28 = sshll.u32 %s249_s3, 4  ;;  %s92_s28 = int_to_ptr.hbm [resolvable:$true] %s91_s28 }
  0x10   :  { %v66_v10 = vmul.f32 %v62_v3, %v56_v0  ;;  %v76_v11 = vperm.slane %v75_v8, 0  ;;  %v67_v12 = vmul.f32 %v63_v6, %v57_v5  ;;  %v77_v13 = vperm.slane %v75_v8, 1  ;;  %s89_s2 = sshll.u32 %s213_s0, 4  ;;  %s90_s2 = int_to_ptr.vmem [resolvable:$true] %s89_s2 }
  0x12   :  { %v73_v14 = vadd.f32 %v69_v4, %v66_v10  ;;  %vm78_vm1 = vcmp.eq.s32.totalorder %v76_v11, 1  ;;  %v74_v15 = vadd.f32 %v70_v9, %v67_v12  ;;  %vm79_vm2 = vcmp.eq.s32.totalorder %v77_v13, 1 }
  0x14   :  { %v80_v16 = vsel %vm78_vm1, %v73_v14, 0.0  ;;  %v81_v17 = vsel %vm79_vm2, %v74_v15, 0.0 }
  0x15   :  { %82 = vst [vmem:[#allocation8] sm:$0xff] %v80_v16 }
  0x16   :  { %83 = vst [vmem:[#allocation8 + $0x8] sm:$0xff] %v81_v17 }
  0x17   :  { %94 = dma.vmem_to_hbm [thread:$0]  %s90_s2, 256, %s92_s28, [#allocation4]  }
  0x18   :  { %207 = dma.done.wait [#allocation4], 256  }
  0x19   :  { %208 = vsyncadd [#allocation4], 4294967040 }
  0x1a   :  { %99 = vsyncpa [#allocation3], 1 }
  0x1b   :  { %100 = vsyncpa [#allocation6], 1 }
  0x1c   :  { %101 = vsyncpa [#allocation4], 1 }

</bundles_post_ra>
